<compile_context>
chip_gen: v7x
topology: tpu7x:2x2x1
jax: 0.10.0
libtpu: 0.0.40
codegen_flags: <defaults>
</compile_context>

<pallas_src>
import functools

import jax
import jax.numpy as jnp
from jax import lax
from jax.experimental import pallas as pl
from jax.experimental.pallas import tpu as pltpu

EMBED_DIMENSION = 300
EMBED_MAX_NORM = 1.0


def _round_up(x, m):
    return (x + m - 1) // m * m


def _renorm_mean_kernel(emb_ref, x_ref):
    # emb_ref: (Bp, C, Dp) gathered embedding rows (zero-padded in B and D)
    # x_ref:   (Bp, Dp)    mean over context of the max_norm-renormed rows
    e = emb_ref[...].astype(jnp.float32)                       # (Bp, C, Dp)
    sq = jnp.sum(e * e, axis=-1, keepdims=True)                # (Bp, C, 1)
    # nn.Embedding(max_norm=1): rows with L2 norm > max_norm rescaled to max_norm.
    # rsqrt lowers to the EUP (its own VLIW slot); the eps keeps all-zero
    # (padding) rows at scale 1 instead of NaN/inf.
    scale = jnp.minimum(jnp.float32(1.0),
                        EMBED_MAX_NORM * lax.rsqrt(sq + 1e-12))
    x = jnp.mean(e * scale, axis=1)                            # (Bp, Dp)
    x_ref[...] = x.astype(x_ref.dtype)


def _logits_kernel(x_ref, w_ref, b_ref, o_ref):
    # x_ref: (Bp, Dp)   pooled context embedding (resident across the vocab grid)
    # w_ref: (Dp, TV)   vocab tile of the (transposed, padded) linear weight
    # b_ref: (1, TV)    vocab tile of the bias
    # o_ref: (Bp, TV)   vocab tile of the logits
    o_ref[...] = (
        jnp.dot(x_ref[...], w_ref[...], preferred_element_type=jnp.float32)
        + b_ref[...]
    )


@functools.partial(jax.jit, static_argnames=("tile_v", "w_dtype"))
def cbow_forward(emb_table, lin_w_t, lin_b, inputs_, *,
                 tile_v=512, w_dtype=jnp.bfloat16):
    """emb_table: (V, D) f32, lin_w_t: (D, V) f32 (transposed nn.Linear weight),
    lin_b: (V,) f32, inputs_: (B, C) int32.  Returns logits (B, V) f32."""
    B, C = inputs_.shape
    D, V = lin_w_t.shape
    assert D == EMBED_DIMENSION

    Dp = _round_up(D, 128)            # 300 -> 384 (3 x 128 lanes)
    Vp = _round_up(V, tile_v)         # vocab padded to the tile width
    Bp = _round_up(B, 8)              # sublane-aligned batch

    # ---- glue: embedding gather + zero-padding / casts (layout, not compute) ----
    gathered = jnp.take(emb_table, inputs_, axis=0)            # (B, C, D)
    gathered = jnp.pad(gathered.astype(jnp.float32),
                       ((0, Bp - B), (0, 0), (0, Dp - D)))     # (Bp, C, Dp)

    # In real use the padded / bf16 weight + bias would be prepared once at
    # init time, not per forward call.
    w = jnp.pad(lin_w_t, ((0, Dp - D), (0, Vp - V))).astype(w_dtype)    # (Dp, Vp)
    b = jnp.pad(lin_b, ((0, Vp - V),)).reshape(1, Vp).astype(jnp.float32)

    # ---- kernel 1: max_norm renorm + context mean (runs exactly once) ----
    x = pl.pallas_call(
        _renorm_mean_kernel,
        out_shape=jax.ShapeDtypeStruct((Bp, Dp), w_dtype),
        grid=(1,),
        in_specs=[pl.BlockSpec((Bp, C, Dp), lambda i: (0, 0, 0))],
        out_specs=pl.BlockSpec((Bp, Dp), lambda i: (0, 0)),
    )(gathered)

    # ---- kernel 2: vocab-tiled, weight-streaming matmul + bias ----
    logits = pl.pallas_call(
        _logits_kernel,
        out_shape=jax.ShapeDtypeStruct((Bp, Vp), jnp.float32),
        grid_spec=pltpu.PrefetchScalarGridSpec(
            num_scalar_prefetch=0,
            grid=(Vp // tile_v,),
            in_specs=[
                pl.BlockSpec((Bp, Dp), lambda j: (0, 0)),       # x: resident
                pl.BlockSpec((Dp, tile_v), lambda j: (0, j)),   # weight vocab tile
                pl.BlockSpec((1, tile_v), lambda j: (0, j)),    # bias vocab tile
            ],
            out_specs=pl.BlockSpec((Bp, tile_v), lambda j: (0, j)),
        ),
        compiler_params=pltpu.CompilerParams(
            dimension_semantics=("parallel",)),
    )(x, w, b)

    return logits[:B, :V]


def _reference(emb_table, lin_w_t, lin_b, inputs_):
    # Pure f32 reference matching torch.nn.Embedding(max_norm=1) + mean + Linear.
    e = jnp.take(emb_table, inputs_, axis=0)
    norm = jnp.linalg.norm(e, axis=-1, keepdims=True)
    scale = jnp.where(norm > EMBED_MAX_NORM, EMBED_MAX_NORM / (norm + 1e-7), 1.0)
    x = jnp.mean(e * scale, axis=1)
    return x @ lin_w_t + lin_b[None, :]


if __name__ == "__main__":
    key = jax.random.PRNGKey(0)
    k_emb, k_w, k_b, k_idx = jax.random.split(key, 4)

    VOCAB = 512       # small synthetic vocab
    B, C = 8, 8       # batch, context window size
    D = EMBED_DIMENSION

    # PyTorch-style init: N(0,1) embedding, U(-1/sqrt(D), 1/sqrt(D)) linear W & b.
    emb_table = jax.random.normal(k_emb, (VOCAB, D), dtype=jnp.float32)
    bound = 1.0 / jnp.sqrt(jnp.float32(D))
    lin_w = jax.random.uniform(k_w, (VOCAB, D), minval=-bound, maxval=bound,
                               dtype=jnp.float32)
    lin_b = jax.random.uniform(k_b, (VOCAB,), minval=-bound, maxval=bound,
                               dtype=jnp.float32)
    lin_w_t = lin_w.T                                            # (D, V)

    inputs_ = jax.random.randint(k_idx, (B, C), 0, VOCAB, dtype=jnp.int32)

    out = cbow_forward(emb_table, lin_w_t, lin_b, inputs_)
    out = jax.block_until_ready(out)

    ref = _reference(emb_table, lin_w_t, lin_b, inputs_)
    assert out.shape == (B, VOCAB)
    # Tolerance accounts for the bf16 weight/activation quantization of the
    # streamed operands (accumulation is f32); worst-case bf16 error here is
    # ~1.5e-3 absolute.
    assert jnp.allclose(out, ref, atol=5e-3, rtol=5e-3), "mismatch vs reference"

    print("KERNEL_OK")
</pallas_src>

<mosaic_0001>
module attributes {stable_mosaic.version = 11 : i64} {
  func.func @_renorm_mean_kernel(%arg0: i32, %arg1: memref<8x8x384xf32, #tpu.memory_space<vmem>>, %arg2: memref<8x384xbf16, #tpu.memory_space<vmem>>) attributes {dimension_semantics = [#tpu.dimension_semantics<arbitrary>], iteration_bounds = array<i64: 1>, scalar_prefetch = 0 : i64, scratch_operands = 0 : i64, tpu.core_type = #tpu.core_type<tc>, window_params = [{pipeline_mode = #tpu.pipeline_mode<synchronous>, transform_indices = @transform_0, window_bounds = array<i64: 8, 8, 384>}, {pipeline_mode = #tpu.pipeline_mode<synchronous>, transform_indices = @transform_1, window_bounds = array<i64: 8, 384>}]} {
    %c0 = arith.constant 0 : index
    %c0_0 = arith.constant 0 : index
    %c0_1 = arith.constant 0 : index
    %0 = vector.load %arg1[%c0, %c0_0, %c0_1] : memref<8x8x384xf32, #tpu.memory_space<vmem>>, vector<8x8x384xf32>
    %1 = arith.mulf %0, %0 : vector<8x8x384xf32>
    %cst = arith.constant dense<0.000000e+00> : vector<8x8xf32>
    %2 = vector.multi_reduction <add>, %1, %cst [2] : vector<8x8x384xf32> to vector<8x8xf32>
    %3 = vector.shape_cast %2 : vector<8x8xf32> to vector<8x8x1xf32>
    %cst_2 = arith.constant 9.99999996E-13 : f32
    %4 = vector.broadcast %cst_2 : f32 to vector<8x8x1xf32>
    %5 = arith.addf %3, %4 : vector<8x8x1xf32>
    %6 = math.rsqrt %5 : vector<8x8x1xf32>
    %cst_3 = arith.constant 1.000000e+00 : f32
    %7 = vector.broadcast %cst_3 : f32 to vector<8x8x1xf32>
    %8 = arith.mulf %7, %6 : vector<8x8x1xf32>
    %cst_4 = arith.constant 1.000000e+00 : f32
    %9 = vector.broadcast %cst_4 : f32 to vector<8x8x1xf32>
    %10 = arith.minimumf %9, %8 : vector<8x8x1xf32>
    %11 = vector.broadcast %10 : vector<8x8x1xf32> to vector<8x8x384xf32>
    %12 = arith.mulf %0, %11 : vector<8x8x384xf32>
    %cst_5 = arith.constant dense<0.000000e+00> : vector<8x384xf32>
    %13 = vector.multi_reduction <add>, %12, %cst_5 [1] : vector<8x8x384xf32> to vector<8x384xf32>
    %cst_6 = arith.constant 8.000000e+00 : f32
    %14 = vector.broadcast %cst_6 : f32 to vector<8x384xf32>
    %15 = arith.divf %13, %14 : vector<8x384xf32>
    %16 = arith.truncf %15 : vector<8x384xf32> to vector<8x384xbf16>
    %c0_7 = arith.constant 0 : index
    %c0_8 = arith.constant 0 : index
    %17 = vector.load %arg2[%c0_7, %c0_8] : memref<8x384xbf16, #tpu.memory_space<vmem>>, vector<8x384xbf16>
    tpu.vector_store %arg2[%c0_7, %c0_8], %16 {strides = array<i32>} : memref<8x384xbf16, #tpu.memory_space<vmem>>, vector<8x384xbf16>,
    return
  }
  func.func @transform_0(%arg0: i32) -> (i32, i32, i32) {
    %c0_i32 = arith.constant 0 : i32
    %c0_i32_0 = arith.constant 0 : i32
    %c0_i32_1 = arith.constant 0 : i32
    %c0_i32_2 = arith.constant 0 : i32
    return %c0_i32, %c0_i32_0, %c0_i32_1 : i32, i32, i32
  }
  func.func @transform_1(%arg0: i32) -> (i32, i32) {
    %c0_i32 = arith.constant 0 : i32
    %c0_i32_0 = arith.constant 0 : i32
    %c0_i32_1 = arith.constant 0 : i32
    return %c0_i32, %c0_i32_0 : i32, i32
  }
}

module attributes {stable_mosaic.version = 11 : i64} {
  func.func @_logits_kernel(%arg0: i32, %arg1: memref<8x384xbf16, #tpu.memory_space<vmem>>, %arg2: memref<384x512xbf16, #tpu.memory_space<vmem>>, %arg3: memref<1x512xf32, #tpu.memory_space<vmem>>, %arg4: memref<8x512xf32, #tpu.memory_space<vmem>>) attributes {dimension_semantics = [#tpu.dimension_semantics<parallel>], iteration_bounds = array<i64: 1>, scalar_prefetch = 0 : i64, scratch_operands = 0 : i64, tpu.core_type = #tpu.core_type<tc>, window_params = [{pipeline_mode = #tpu.pipeline_mode<synchronous>, transform_indices = @transform_0, window_bounds = array<i64: 8, 384>}, {transform_indices = @transform_1, window_bounds = array<i64: 384, 512>}, {transform_indices = @transform_2, window_bounds = array<i64: 1, 512>}, {transform_indices = @transform_3, window_bounds = array<i64: 8, 512>}]} {
    %c0 = arith.constant 0 : index
    %c0_0 = arith.constant 0 : index
    %0 = vector.load %arg1[%c0, %c0_0] : memref<8x384xbf16, #tpu.memory_space<vmem>>, vector<8x384xbf16>
    %c0_1 = arith.constant 0 : index
    %c0_2 = arith.constant 0 : index
    %1 = vector.load %arg2[%c0_1, %c0_2] : memref<384x512xbf16, #tpu.memory_space<vmem>>, vector<384x512xbf16>
    %cst = arith.constant dense<0.000000e+00> : vector<8x512xf32>
    %2 = tpu.matmul %0, %1, %cst {dimension_numbers = #tpu.dot_dimension_numbers<[1], [0], [0], [1], [0, 0, 1, 1], [], []>} : vector<8x384xbf16>, vector<384x512xbf16>, vector<8x512xf32> -> vector<8x512xf32>
    %c0_3 = arith.constant 0 : index
    %c0_4 = arith.constant 0 : index
    %3 = vector.load %arg3[%c0_3, %c0_4] : memref<1x512xf32, #tpu.memory_space<vmem>>, vector<1x512xf32>
    %4 = vector.broadcast %3 : vector<1x512xf32> to vector<8x512xf32>
    %5 = arith.addf %2, %4 : vector<8x512xf32>
    %c0_5 = arith.constant 0 : index
    %c0_6 = arith.constant 0 : index
    %6 = vector.load %arg4[%c0_5, %c0_6] : memref<8x512xf32, #tpu.memory_space<vmem>>, vector<8x512xf32>
    tpu.vector_store %arg4[%c0_5, %c0_6], %5 {strides = array<i32>} : memref<8x512xf32, #tpu.memory_space<vmem>>, vector<8x512xf32>,
    return
  }
  func.func @transform_0(%arg0: i32) -> (i32, i32) {
    %c0_i32 = arith.constant 0 : i32
    %c0_i32_0 = arith.constant 0 : i32
    %c0_i32_1 = arith.constant 0 : i32
    return %c0_i32, %c0_i32_0 : i32, i32
  }
  func.func @transform_1(%arg0: i32) -> (i32, i32) {
    %c0_i32 = arith.constant 0 : i32
    %c0_i32_0 = arith.constant 0 : i32
    return %c0_i32, %arg0 : i32, i32
  }
  func.func @transform_2(%arg0: i32) -> (i32, i32) {
    %c0_i32 = arith.constant 0 : i32
    %c0_i32_0 = arith.constant 0 : i32
    return %c0_i32, %arg0 : i32, i32
  }
  func.func @transform_3(%arg0: i32) -> (i32, i32) {
    %c0_i32 = arith.constant 0 : i32
    %c0_i32_0 = arith.constant 0 : i32
    return %c0_i32, %arg0 : i32, i32
  }
}

</mosaic_0001>

<bundles_post_ra>
// kernel: cbow_forward.2
= control target key start
LH: loop header
LB: loop body
LE: loop exit
PB: predicated region body
PF: predicated region fallthrough
CT: control target
= control target key end

     0   :  { %vm417_vm0 = vcmask 1041409   ;;  %vm419_vm1 = vcmask 1042434   ;;  %vm421_vm2 = vcmask 1043459   ;;  %vm423_vm3 = vcmask 1044484   ;;  %s773_s0 = inlined_call_operand.vmem [shape: f32[8,8,384], index: 0, kind: input, shape index: {}]   ;;  %s774_s1 = inlined_call_operand.vmem [shape: bf16[8,384], index: 1, kind: output, shape index: {}]  }
   0x1   :  { %v516_v0 = vld [vmem:[%s773_s0 + $0x30] sm:$0xff]  ;;  %v521_v1 = vld [vmem:[%s773_s0 + $0x38] sm:$0xff]  ;;  %v526_v2 = vld [vmem:[%s773_s0 + $0x40] sm:$0xff]  ;;  %vm425_vm4 = vcmask 1045509   ;;  %vm427_vm5 = vcmask 1046534   ;;  %vm429_vm6 = vcmask 1047559  }
   0x2   :  { %v38_v3 = vmul.f32 %v516_v0, %v516_v0  ;;  %v39_v4 = vmul.f32 %v521_v1, %v521_v1  ;;  %v40_v5 = vmul.f32 %v526_v2, %v526_v2  ;;  %v537_v6 = vld [vmem:[%s773_s0] sm:$0xff]  ;;  %v542_v7 = vld [vmem:[%s773_s0 + $0x8] sm:$0xff]  ;;  %v547_v8 = vld [vmem:[%s773_s0 + $0x10] sm:$0xff] }
   0x3   :  { %v32_v9 = vmul.f32 %v537_v6, %v537_v6  ;;  %v33_v10 = vmul.f32 %v542_v7, %v542_v7  ;;  %v34_v11 = vmul.f32 %v547_v8, %v547_v8  ;;  %v558_v12 = vld [vmem:[%s773_s0 + $0x48] sm:$0xff]  ;;  %v563_v13 = vld [vmem:[%s773_s0 + $0x50] sm:$0xff]  ;;  %v568_v14 = vld [vmem:[%s773_s0 + $0x58] sm:$0xff] }
   0x4   :  { %v64_v15 = vadd.f32 %v39_v4, %v38_v3  ;;  %v41_v16 = vmul.f32 %v558_v12, %v558_v12  ;;  %v42_v17 = vmul.f32 %v563_v13, %v563_v13  ;;  %v43_v18 = vmul.f32 %v568_v14, %v568_v14  ;;  %v579_v19 = vld [vmem:[%s773_s0 + $0x18] sm:$0xff]  ;;  %v584_v20 = vld [vmem:[%s773_s0 + $0x20] sm:$0xff]  ;;  %v589_v21 = vld [vmem:[%s773_s0 + $0x28] sm:$0xff] }
   0x5   :  { %v56_v22 = vadd.f32 %v33_v10, %v32_v9  ;;  %v35_v23 = vmul.f32 %v579_v19, %v579_v19  ;;  %v36_v24 = vmul.f32 %v584_v20, %v584_v20  ;;  %v37_v25 = vmul.f32 %v589_v21, %v589_v21  ;;  %v600_v26 = vld [vmem:[%s773_s0 + $0x78] sm:$0xff]  ;;  %v605_v27 = vld [vmem:[%s773_s0 + $0x80] sm:$0xff]  ;;  %v610_v28 = vld [vmem:[%s773_s0 + $0x88] sm:$0xff] }
   0x6   :  { %v65_v29 = vadd.f32 %v64_v15, %v40_v5  ;;  %v68_v30 = vadd.f32 %v42_v17, %v41_v16  ;;  %v47_v31 = vmul.f32 %v600_v26, %v600_v26  ;;  %v48_v32 = vmul.f32 %v605_v27, %v605_v27  ;;  %v619_v33 = vld [vmem:[%s773_s0 + $0x60] sm:$0xff]  ;;  %v624_v34 = vld [vmem:[%s773_s0 + $0x68] sm:$0xff]  ;;  %v629_v35 = vld [vmem:[%s773_s0 + $0x70] sm:$0xff] }
   0x7   :  { %v57_v36 = vadd.f32 %v56_v22, %v34_v11  ;;  %v60_v37 = vadd.f32 %v36_v24, %v35_v23  ;;  %v44_v38 = vmul.f32 %v619_v33, %v619_v33  ;;  %v636_v39 = vld [vmem:[%s773_s0 + $0xa8] sm:$0xff]  ;;  %v641_v40 = vld [vmem:[%s773_s0 + $0xb0] sm:$0xff]  ;;  %v49_v42 = vmul.f32 %v610_v28, %v610_v28  ;;  %v655_v46 = vld [vmem:[%s773_s0 + $0x98] sm:$0xff] }
   0x8   :  { %66 = vadd.xlane.f32.xlu1 %v65_v29  ;;  %v69_v41 = vadd.f32 %v68_v30, %v43_v18  ;;  %v76_v43 = vadd.f32 %v48_v32, %v47_v31  ;;  %v45_v44 = vmul.f32 %v624_v34, %v624_v34  ;;  %v650_v45 = vld [vmem:[%s773_s0 + $0x90] sm:$0xff]  ;;  %v46_v48 = vmul.f32 %v629_v35, %v629_v35  ;;  %v662_v49 = vld [vmem:[%s773_s0 + $0xb8] sm:$0xff]  ;;  %v671_v53 = vld [vmem:[%s773_s0 + $0xa0] sm:$0xff] }
   0x9   :  { %58 = vadd.xlane.f32.xlu0 %v57_v36  ;;  %v61_v47 = vadd.f32 %v60_v37, %v37_v25  ;;  %v53_v50 = vmul.f32 %v636_v39, %v636_v39  ;;  %v54_v51 = vmul.f32 %v641_v40, %v641_v40  ;;  %v50_v54 = vmul.f32 %v650_v45, %v650_v45 }
   0xa   :  { %v72_v52 = vadd.f32 %v45_v44, %v44_v38  ;;  %v51_v55 = vmul.f32 %v655_v46, %v655_v46  ;;  %v77_v56 = vadd.f32 %v76_v43, %v49_v42  ;;  %v55_v57 = vmul.f32 %v662_v49, %v662_v49 }
   0xb   :  { %v84_v58 = vadd.f32 %v54_v51, %v53_v50  ;;  %v52_v60 = vmul.f32 %v671_v53, %v671_v53 }
   0xc   :  { %70 = vadd.xlane.f32.xlu1 %v69_v41  ;;  %v73_v59 = vadd.f32 %v72_v52, %v46_v48  ;;  %v80_v61 = vadd.f32 %v51_v55, %v50_v54 }
   0xd   :  { %62 = vadd.xlane.f32.xlu0 %v61_v47  ;;  %v85_v62 = vadd.f32 %v84_v58, %v55_v57 }
   0xe   :  { %v81_v63 = vadd.f32 %v80_v61, %v52_v60 }
  0x10   :  { %78 = vadd.xlane.f32.xlu1 %v77_v56 }
  0x11   :  { %74 = vadd.xlane.f32.xlu0 %v73_v59 }
  0x14   :  { %86 = vadd.xlane.f32.xlu1 %v85_v62 }
  0x15   :  { %82 = vadd.xlane.f32.xlu0 %v81_v63 }
  0x95   :  { %v67_v3 = vpop.xlane.xlu1 %66 }
  0x96   :  { %v90_v4 = vadd.f32 1e-12, %v67_v3  ;;  %v59_v5 = vpop.xlane.xlu0 %58 }
  0x97   :  { %v88_v9 = vadd.f32 1e-12, %v59_v5 }
  0x98   :  { %487 = vrsqrt.f32 %v90_v4 }
  0x99   :  { %489 = vrsqrt.f32 %v88_v9  ;;  %v71_v10 = vpop.xlane.xlu1 %70 }
  0x9a   :  { %v91_v11 = vadd.f32 1e-12, %v71_v10  ;;  %v63_v15 = vpop.xlane.xlu0 %62 }
  0x9b   :  { %v89_v16 = vadd.f32 1e-12, %v63_v15 }
  0x9c   :  { %491 = vrsqrt.f32 %v91_v11 }
  0x9d   :  { %493 = vrsqrt.f32 %v89_v16  ;;  %v79_v37 = vpop.xlane.xlu1 %78 }
  0x9e   :  { %v75_v51 = vpop.xlane.xlu0 %74 }
  0x9f   :  { %v92_v58 = vadd.f32 1e-12, %v75_v51 }
  0xa1   :  { %v87_v10 = vpop.xlane.xlu1 %86 }
  0xa2   :  { %v488_v17 = vpop.eup %487  ;;  %v83_v15 = vpop.xlane.xlu0 %82 }
  0xa3   :  { %v490_v18 = vpop.eup %489  ;;  %v106_v22 = vmin.f32 %v488_v17, 1.0 }
  0xa4   :  { %v104_v23 = vmin.f32 %v490_v18, 1.0 }
  0xa5   :  { %v118_v24 = vmul.f32 %v106_v22, %v516_v0  ;;  %v119_v25 = vmul.f32 %v106_v22, %v521_v1  ;;  %v120_v29 = vmul.f32 %v106_v22, %v526_v2  ;;  %v93_v2 = vadd.f32 1e-12, %v79_v37 }
  0xa6   :  { %v492_v30 = vpop.eup %491  ;;  %v112_v31 = vmul.f32 %v104_v23, %v537_v6  ;;  %v113_v32 = vmul.f32 %v104_v23, %v542_v7  ;;  %v114_v36 = vmul.f32 %v104_v23, %v547_v8  ;;  %v95_v23 = vadd.f32 1e-12, %v87_v10 }
  0xa7   :  { %v172_v38 = vrot.slane %v118_v24, 4  ;;  %v178_v41 = vrot.slane %v119_v25, 4  ;;  %v184_v42 = vrot.slane %v120_v29, 4  ;;  %v107_v43 = vmin.f32 %v492_v30, 1.0  ;;  %v494_v63 = vpop.eup %493 }
  0xa8   :  { %v136_v44 = vrot.slane %v112_v31, 4  ;;  %v142_v47 = vrot.slane %v113_v32, 4  ;;  %v148_v0 = vrot.slane %v114_v36, 4  ;;  %495 = vrsqrt.f32 %v93_v2 }
  0xa9   :  { %v173_v48 = vadd.f32 %v172_v38, %v118_v24  ;;  %v179_v1 = vadd.f32 %v178_v41, %v119_v25  ;;  %v185_v50 = vadd.f32 %v184_v42, %v120_v29  ;;  %v121_v7 = vmul.f32 %v107_v43, %v558_v12 }
  0xaa   :  { %v137_v52 = vadd.f32 %v136_v44, %v112_v31  ;;  %v143_v54 = vadd.f32 %v142_v47, %v113_v32  ;;  %v149_v6 = vadd.f32 %v148_v0, %v114_v36  ;;  %v122_v8 = vmul.f32 %v107_v43, %v563_v13 }
  0xab   :  { %v174_v55 = vrot.slane %v173_v48, 2  ;;  %v180_v56 = vrot.slane %v179_v1, 2  ;;  %v186_v57 = vrot.slane %v185_v50, 2  ;;  %v190_v62 = vrot.slane %v121_v7, 4 }
  0xac   :  { %v138_v59 = vrot.slane %v137_v52, 2  ;;  %v144_v60 = vrot.slane %v143_v54, 2  ;;  %v150_v61 = vrot.slane %v149_v6, 2  ;;  %v196_v3 = vrot.slane %v122_v8, 4 }
  0xad   :  { %v175_v4 = vadd.f32 %v174_v55, %v173_v48  ;;  %v181_v5 = vadd.f32 %v180_v56, %v179_v1  ;;  %v187_v9 = vadd.f32 %v186_v57, %v185_v50  ;;  %497 = vrsqrt.f32 %v92_v58 }
  0xae   :  { %v139_v11 = vadd.f32 %v138_v59, %v137_v52  ;;  %v145_v12 = vadd.f32 %v144_v60, %v143_v54  ;;  %v151_v13 = vadd.f32 %v150_v61, %v149_v6  ;;  %v191_v16 = vadd.f32 %v190_v62, %v121_v7 }
  0xaf   :  { %v105_v17 = vmin.f32 %v494_v63, 1.0  ;;  %v123_v18 = vmul.f32 %v107_v43, %v568_v14  ;;  %v197_v22 = vadd.f32 %v196_v3, %v122_v8  ;;  %v176_v24 = vrot.slane %v175_v4, 1 }
  0xb0   :  { %v182_v25 = vrot.slane %v181_v5, 1  ;;  %v188_v29 = vrot.slane %v187_v9, 1  ;;  %v94_v30 = vadd.f32 1e-12, %v83_v15  ;;  %v140_v31 = vrot.slane %v139_v11, 1 }
  0xb1   :  { %v146_v32 = vrot.slane %v145_v12, 1  ;;  %v152_v36 = vrot.slane %v151_v13, 1  ;;  %v192_v37 = vrot.slane %v191_v16, 2  ;;  %v115_v38 = vmul.f32 %v105_v17, %v579_v19 }
  0xb2   :  { %v496_v41 = vpop.eup %495  ;;  %v198_v42 = vrot.slane %v197_v22, 2  ;;  %v202_v44 = vrot.slane %v123_v18, 4  ;;  %499 = vrsqrt.f32 %v95_v23  ;;  %v177_v47 = vadd.f32 %v176_v24, %v175_v4 }
  0xb3   :  { %v183_v0 = vadd.f32 %v182_v25, %v181_v5  ;;  %v189_v48 = vadd.f32 %v188_v29, %v187_v9  ;;  %501 = vrsqrt.f32 %v94_v30  ;;  %v141_v14 = vadd.f32 %v140_v31, %v139_v11 }
  0xb4   :  { %v147_v43 = vadd.f32 %v146_v32, %v145_v12  ;;  %v116_v1 = vmul.f32 %v105_v17, %v584_v20  ;;  %v117_v50 = vmul.f32 %v105_v17, %v589_v21  ;;  %v153_v51 = vadd.f32 %v152_v36, %v151_v13 }
  0xb5   :  { %v193_v52 = vadd.f32 %v192_v37, %v191_v16  ;;  %v154_v54 = vrot.slane %v115_v38, 4  ;;  %v109_v6 = vmin.f32 %v496_v41, 1.0  ;;  %v199_v19 = vadd.f32 %v198_v42, %v197_v22 }
  0xb6   :  { %v203_v7 = vadd.f32 %v202_v44, %v123_v18  ;;  %v160_v8 = vrot.slane %v116_v1, 4  ;;  %v166_v55 = vrot.slane %v117_v50, 4  ;;  %v287_v56 = vmul.f32 0.125, %v177_v47 }
  0xb7   :  { %v498_v2 = vpop.eup %497  ;;  %v155_v57 = vadd.f32 %v154_v54, %v115_v38  ;;  %v127_v58 = vmul.f32 %v109_v6, %v600_v26  ;;  %v128_v59 = vmul.f32 %v109_v6, %v605_v27  ;;  %v288_v60 = vmul.f32 0.125, %v183_v0 }
  0xb8   :  { %v161_v61 = vadd.f32 %v160_v8, %v116_v1  ;;  %v167_v20 = vadd.f32 %v166_v55, %v117_v50  ;;  %v108_v62 = vmin.f32 %v498_v2, 1.0  ;;  %v194_v21 = vrot.slane %v193_v52, 1 }
  0xb9   :  { %v156_v63 = vrot.slane %v155_v57, 2  ;;  %v129_v3 = vmul.f32 %v109_v6, %v610_v28  ;;  %v226_v4 = vrot.slane %v127_v58, 4  ;;  %v200_v5 = vrot.slane %v199_v19, 1 }
  0xba   :  { %v204_v9 = vrot.slane %v203_v7, 2  ;;  %v162_v10 = vrot.slane %v161_v61, 2  ;;  %v168_v11 = vrot.slane %v167_v20, 2  ;;  %v289_v12 = vmul.f32 0.125, %v189_v48 }
  0xbb   :  { %v157_v15 = vadd.f32 %v156_v63, %v155_v57  ;;  %v227_v13 = vadd.f32 %v226_v4, %v127_v58  ;;  %v232_v16 = vrot.slane %v128_v59, 4  ;;  %v281_v17 = vmul.f32 0.125, %v141_v14 }
  0xbc   :  { %v500_v26 = vpop.eup %499  ;;  %v163_v27 = vadd.f32 %v162_v10, %v161_v61  ;;  %v238_v18 = vrot.slane %v129_v3, 4  ;;  %v124_v22 = vmul.f32 %v108_v62, %v619_v33  ;;  %v282_v24 = vmul.f32 0.125, %v147_v43 }
  0xbd   :  { %v697_v23 = vpop.eup %501  ;;  %v283_v25 = vmul.f32 0.125, %v153_v51  ;;  %v158_v28 = vrot.slane %v157_v15, 1  ;;  %v169_v29 = vadd.f32 %v168_v11, %v167_v20  ;;  %v195_v30 = vadd.f32 %v194_v21, %v193_v52 }
  0xbe   :  { %v201_v31 = vadd.f32 %v200_v5, %v199_v19  ;;  %v205_v32 = vadd.f32 %v204_v9, %v203_v7  ;;  %v164_v36 = vrot.slane %v163_v27, 1  ;;  %v228_v37 = vrot.slane %v227_v13, 2 }
  0xbf   :  { %v233_v38 = vadd.f32 %v232_v16, %v128_v59  ;;  %v125_v41 = vmul.f32 %v108_v62, %v624_v34  ;;  %v126_v42 = vmul.f32 %v108_v62, %v629_v35  ;;  %v701_v44 = vpack.c.bf16 %v288_v60, %v287_v56 }
  0xc0   :  { %v476_v47 = vpack.c.bf16 %v289_v12, %v289_v12  ;;  %v239_v33 = vadd.f32 %v238_v18, %v129_v3  ;;  %v208_v0 = vrot.slane %v124_v22, 4  ;;  %v703_v48 = vpack.c.bf16 %v282_v24, %v281_v17 }
  0xc1   :  { %v159_v14 = vadd.f32 %v158_v28, %v157_v15  ;;  %v165_v43 = vadd.f32 %v164_v36, %v163_v27  ;;  %v170_v1 = vrot.slane %v169_v29, 1  ;;  %v206_v50 = vrot.slane %v205_v32, 1 }
  0xc2   :  { %v290_v2 = vmul.f32 0.125, %v195_v30  ;;  %v291_v51 = vmul.f32 0.125, %v201_v31  ;;  %v209_v52 = vadd.f32 %v208_v0, %v124_v22  ;;  %v229_v54 = vadd.f32 %v228_v37, %v227_v13 }
  0xc3   :  { %v234_v6 = vrot.slane %v233_v38, 2  ;;  %v214_v19 = vrot.slane %v125_v41, 4  ;;  %v220_v34 = vrot.slane %v126_v42, 4  ;;  %v399_v35 = vunpack.c.l.b16 %v701_v44 }
  0xc4   :  { %v472_v7 = vpack.c.bf16 %v283_v25, %v283_v25  ;;  %v240_v8 = vrot.slane %v239_v33, 2  ;;  %v210_v55 = vrot.slane %v209_v52, 2  ;;  %v171_v56 = vadd.f32 %v170_v1, %v169_v29 }
  0xc5   :  { %v284_v57 = vmul.f32 0.125, %v159_v14  ;;  %v285_v58 = vmul.f32 0.125, %v165_v43  ;;  %v215_v59 = vadd.f32 %v214_v19, %v125_v41  ;;  %v400_v60 = vunpack.c.h.b16 %v701_v44 }
  0xc6   :  { %v207_v61 = vadd.f32 %v206_v50, %v205_v32  ;;  %v707_v20 = vpack.c.bf16 %v291_v51, %v290_v2  ;;  %v221_v62 = vadd.f32 %v220_v34, %v126_v42  ;;  %v230_v21 = vrot.slane %v229_v54, 1 }
  0xc7   :  { %v235_v63 = vadd.f32 %v234_v6, %v233_v38  ;;  %v211_v3 = vadd.f32 %v210_v55, %v209_v52  ;;  %v216_v4 = vrot.slane %v215_v59, 2  ;;  %v709_v5 = vunpack.c.l.b16 %v476_v47 }
  0xc8   :  { %v393_v9 = vunpack.c.l.b16 %v703_v48  ;;  %v712_v10 = vadd.f32 %v240_v8, %v239_v33  ;;  %v111_v11 = vmin.f32 %v500_v26, 1.0  ;;  %v394_v12 = vunpack.c.h.b16 %v703_v48 }
  0xc9   :  { %v715_v15 = vunpack.c.l.b16 %v472_v7  ;;  %v717_v13 = vmul.f32 0.125, %v171_v56  ;;  %v473_v16 = vpack.c.bf16 %v285_v58, %v284_v57  ;;  %v719_v17 = vmul.f32 0.125, %v207_v61 }
  0xca   :  { %v402_v27 = vunpack.c.l.b16 %v707_v20  ;;  %v403_v18 = vunpack.c.h.b16 %v707_v20  ;;  %v222_v22 = vrot.slane %v221_v62, 2  ;;  %v231_v24 = vadd.f32 %v230_v21, %v229_v54 }
  0xcb   :  { %v236_v25 = vrot.slane %v235_v63, 1  ;;  %v212_v28 = vrot.slane %v211_v3, 1  ;;  %v217_v29 = vadd.f32 %v216_v4, %v215_v59  ;;  %v242_v26 = vrot.slane %v712_v10, 1 }
  0xcc   :  { %v133_v30 = vmul.f32 %v111_v11, %v636_v39  ;;  %v134_v31 = vmul.f32 %v111_v11, %v641_v40  ;;  %v135_v32 = vmul.f32 %v111_v11, %v662_v49  ;;  %v474_v36 = vpack.c.bf16 %v717_v13, %v717_v13 }
  0xcd   :  { %v396_v37 = vunpack.c.l.b16 %v473_v16  ;;  %v218_v38 = vrot.slane %v217_v29, 1  ;;  %v110_v41 = vmin.f32 %v697_v23, 1.0  ;;  %v223_v42 = vadd.f32 %v222_v22, %v221_v62 }
  0xce   :  { %v262_v47 = vrot.slane %v133_v30, 4  ;;  %v268_v33 = vrot.slane %v134_v31, 4  ;;  %v274_v0 = vrot.slane %v135_v32, 4  ;;  %v237_v48 = vadd.f32 %v236_v25, %v235_v63 }
  0xcf   :  { %v213_v14 = vadd.f32 %v212_v28, %v211_v3  ;;  %v130_v43 = vmul.f32 %v110_v41, %v650_v45  ;;  %v131_v39 = vmul.f32 %v110_v41, %v655_v46  ;;  %v219_v40 = vadd.f32 %v218_v38, %v217_v29 }
  0xd0   :  { %v263_v49 = vadd.f32 %v262_v47, %v133_v30  ;;  %v269_v1 = vadd.f32 %v268_v33, %v134_v31  ;;  %v275_v50 = vadd.f32 %v274_v0, %v135_v32  ;;  %v397_v2 = vunpack.c.h.b16 %v473_v16 }
  0xd1   :  { %v418_v51 = vsel %vm417_vm0, %v396_v37, %v393_v9  ;;  %v244_v52 = vrot.slane %v130_v43, 4  ;;  %v250_v23 = vrot.slane %v131_v39, 4  ;;  %v224_v54 = vrot.slane %v223_v42, 1 }
  0xd2   :  { %v264_v6 = vrot.slane %v263_v49, 2  ;;  %v270_v19 = vrot.slane %v269_v1, 2  ;;  %v276_v34 = vrot.slane %v275_v50, 2  ;;  %v293_v7 = vmul.f32 0.125, %v213_v14 }
  0xd3   :  { %v132_v8 = vmul.f32 %v110_v41, %v671_v53  ;;  %v245_v45 = vadd.f32 %v244_v52, %v130_v43  ;;  %v251_v55 = vadd.f32 %v250_v23, %v131_v39  ;;  %v294_v46 = vmul.f32 0.125, %v219_v40 }
  0xd4   :  { %v265_v56 = vadd.f32 %v264_v6, %v263_v49  ;;  %v271_v57 = vadd.f32 %v270_v19, %v269_v1  ;;  %v277_v58 = vadd.f32 %v276_v34, %v275_v50  ;;  %v296_v59 = vmul.f32 0.125, %v231_v24 }
  0xd5   :  { %v297_v61 = vmul.f32 0.125, %v237_v48  ;;  %v246_v62 = vrot.slane %v245_v45, 2  ;;  %v252_v21 = vrot.slane %v251_v55, 2  ;;  %v420_v63 = vsel %vm419_vm1, %v399_v35, %v418_v51 }
  0xd6   :  { %v431_v3 = vsel %vm417_vm0, %v397_v2, %v394_v12  ;;  %v266_v4 = vrot.slane %v265_v56, 1  ;;  %v272_v9 = vrot.slane %v271_v57, 1  ;;  %v225_v53 = vadd.f32 %v224_v54, %v223_v42 }
  0xd7   :  { %v247_v11 = vadd.f32 %v246_v62, %v245_v45  ;;  %v253_v13 = vadd.f32 %v252_v21, %v251_v55  ;;  %v256_v16 = vrot.slane %v132_v8, 4  ;;  %v479_v22 = vpack.c.bf16 %v294_v46, %v293_v7 }
  0xd8   :  { %v267_v25 = vadd.f32 %v266_v4, %v265_v56  ;;  %v273_v28 = vadd.f32 %v272_v9, %v271_v57  ;;  %v278_v24 = vrot.slane %v277_v58, 1  ;;  %v398_v29 = vunpack.c.l.b16 %v474_v36 }
  0xd9   :  { %v243_v30 = vadd.f32 %v242_v26, %v712_v10  ;;  %v481_v31 = vpack.c.bf16 %v297_v61, %v296_v59  ;;  %v248_v32 = vrot.slane %v247_v11, 1  ;;  %v432_v35 = vsel %vm419_vm1, %v400_v60, %v431_v3 }
  0xda   :  { %v302_v12 = vmul.f32 0.125, %v267_v25  ;;  %v303_v37 = vmul.f32 0.125, %v273_v28  ;;  %v254_v38 = vrot.slane %v253_v13, 1  ;;  %v422_v41 = vsel %vm421_vm2, %v402_v27, %v420_v63 }
  0xdb   :  { %v295_v42 = vmul.f32 0.125, %v225_v53  ;;  %v249_v47 = vadd.f32 %v248_v32, %v247_v11  ;;  %v257_v36 = vadd.f32 %v256_v16, %v132_v8  ;;  %v405_v33 = vunpack.c.l.b16 %v479_v22 }
  0xdc   :  { %v406_v10 = vunpack.c.h.b16 %v479_v22  ;;  %v279_v26 = vadd.f32 %v278_v24, %v277_v58  ;;  %v255_v0 = vadd.f32 %v254_v38, %v253_v13  ;;  %v433_v44 = vsel %vm421_vm2, %v403_v18, %v432_v35 }
  0xdd   :  { %v485_v60 = vpack.c.bf16 %v303_v37, %v302_v12  ;;  %v258_v48 = vrot.slane %v257_v36, 2  ;;  %v299_v14 = vmul.f32 0.125, %v249_v47  ;;  %v478_v43 = vpack.c.bf16 %v719_v17, %v719_v17 }
  0xde   :  { %v438_v27 = vsel %vm417_vm0, %v398_v29, %v715_v15  ;;  %v298_v39 = vmul.f32 0.125, %v243_v30  ;;  %v300_v40 = vmul.f32 0.125, %v255_v0  ;;  %v408_v49 = vunpack.c.l.b16 %v481_v31 }
  0xdf   :  { %v409_v1 = vunpack.c.h.b16 %v481_v31  ;;  %v480_v50 = vpack.c.bf16 %v295_v42, %v295_v42  ;;  %v259_v2 = vadd.f32 %v258_v48, %v257_v36  ;;  %v424_v51 = vsel %vm423_vm3, %v405_v33, %v422_v41 }
  0xe0   :  { %v434_v20 = vsel %vm423_vm3, %v406_v10, %v433_v44  ;;  %v304_v18 = vmul.f32 0.125, %v279_v26  ;;  %v483_v52 = vpack.c.bf16 %v300_v40, %v299_v14  ;;  %v439_v23 = vsel %vm419_vm1, %v709_v5, %v438_v27 }
  0xe1   :  { %v414_v54 = vunpack.c.l.b16 %v485_v60  ;;  %v415_v17 = vunpack.c.h.b16 %v485_v60  ;;  %v260_v6 = vrot.slane %v259_v2, 1  ;;  %v404_v19 = vunpack.c.l.b16 %v478_v43 }
  0xe2   :  { %v482_v15 = vpack.c.bf16 %v298_v39, %v298_v39  ;;  %v411_v34 = vunpack.c.l.b16 %v483_v52  ;;  %v412_v7 = vunpack.c.h.b16 %v483_v52  ;;  %v407_v8 = vunpack.c.l.b16 %v480_v50 }
  0xe3   :  { %v426_v45 = vsel %vm425_vm4, %v408_v49, %v424_v51  ;;  %v435_v55 = vsel %vm425_vm4, %v409_v1, %v434_v20  ;;  %v261_v46 = vadd.f32 %v260_v6, %v259_v2  ;;  %v440_v56 = vsel %vm421_vm2, %v404_v19, %v439_v23 }
  0xe4   :  { %v486_v57 = vpack.c.bf16 %v304_v18, %v304_v18  ;;  %v428_v58 = vsel %vm427_vm5, %v411_v34, %v426_v45  ;;  %v436_v5 = vsel %vm427_vm5, %v412_v7, %v435_v55  ;;  %v410_v21 = vunpack.c.l.b16 %v482_v15 }
  0xe5   :  { %v301_v59 = vmul.f32 0.125, %v261_v46  ;;  %v430_v61 = vsel %vm429_vm6, %v414_v54, %v428_v58  ;;  %v437_v62 = vsel %vm429_vm6, %v415_v17, %v436_v5  ;;  %v441_v3 = vsel %vm423_vm3, %v407_v8, %v440_v56 }
  0xe6   :  { %v445_v63 = vpack.c.b16 %v437_v62, %v430_v61  ;;  %v416_v9 = vunpack.c.l.b16 %v486_v57  ;;  %v442_v11 = vsel %vm425_vm4, %v410_v21, %v441_v3 }
  0xe7   :  { %v484_v4 = vpack.c.bf16 %v301_v59, %v301_v59 }
  0xe8   :  { %449 = vst [vmem:[%s774_s1] sm:$0xff] %v445_v63 }
  0xe9   :  { %v413_v53 = vunpack.c.l.b16 %v484_v4 }
  0xeb   :  { %v443_v13 = vsel %vm427_vm5, %v413_v53, %v442_v11 }
  0xec   :  { %v444_v16 = vsel %vm429_vm6, %v416_v9, %v443_v13 }
  0xed   :  { %v446_v22 = vpack.c.b16 %v444_v16, %v444_v16 }
  0xef   :  { %450 = vst [vmem:[%s774_s1 + $0x8] sm:$0xf] %v446_v22 }

// kernel: cbow_forward.3
= control target key start
LH: loop header
LB: loop body
LE: loop exit
PB: predicated region body
PF: predicated region fallthrough
CT: control target
= control target key end

     0   :  { %s1424_s0 = inlined_call_operand.vmem [shape: bf16[8,384], index: 0, kind: input, shape index: {}]   ;;  %s1425_s1 = inlined_call_operand.vmem [shape: bf16[384,512], index: 1, kind: input, shape index: {}]   ;;  %s1426_s2 = inlined_call_operand.vmem [shape: f32[1,512], index: 2, kind: input, shape index: {}]   ;;  %s1427_s3 = inlined_call_operand.hbm [shape: f32[8,512], index: 3, kind: output, shape index: {}]  }
   0x1   :  { %v922_v0 = vld [vmem:[%s1425_s1 + $0x4] ss:$16 sps:$4 sm:$0xff]   ;;  %v924_v1 = vld [vmem:[%s1425_s1 + $0xc] ss:$16 sps:$4 sm:$0xff]   ;;  %v926_v2 = vld [vmem:[%s1425_s1] ss:$16 sps:$4 sm:$0xff]  }
   0x2   :  { %627 = vmatprep.subr.bf16.mxu0 %v922_v0  ;;  %v927_v3 = vld [vmem:[%s1425_s1 + $0x8] ss:$16 sps:$4 sm:$0xff]   ;;  %709 = vmatprep.subr.bf16.mxu1 %v924_v1  ;;  %v928_v4 = vld [vmem:[%s1425_s1 + $0x24] ss:$16 sps:$4 sm:$0xff]   ;;  %v930_v5 = vld [vmem:[%s1425_s1 + $0x2c] ss:$16 sps:$4 sm:$0xff]  }
   0x3   :  { %628 = vmatpush1.bf16.msra.mxu0 %v926_v2  ;;  %710 = vmatpush1.bf16.msra.mxu1 %v927_v3  ;;  %v932_v6 = vld [vmem:[%s1425_s1 + $0x20] ss:$16 sps:$4 sm:$0xff]   ;;  %v933_v7 = vld [vmem:[%s1425_s1 + $0x28] ss:$16 sps:$4 sm:$0xff]   ;;  %v934_v8 = vld [vmem:[%s1425_s1 + $0x44] ss:$16 sps:$4 sm:$0xff]  }
   0x4   :  { %629 = vmatprep.subr.bf16.mxu0 %v928_v4  ;;  %711 = vmatprep.subr.bf16.mxu1 %v930_v5  ;;  %v936_v9 = vld [vmem:[%s1425_s1 + $0x4c] ss:$16 sps:$4 sm:$0xff]   ;;  %v938_v10 = vld [vmem:[%s1425_s1 + $0x40] ss:$16 sps:$4 sm:$0xff]   ;;  %v939_v11 = vld [vmem:[%s1425_s1 + $0x48] ss:$16 sps:$4 sm:$0xff]  }
   0x5   :  { %v940_v12 = vld [vmem:[%s1425_s1 + $0x64] ss:$16 sps:$4 sm:$0xff]   ;;  %v942_v13 = vld [vmem:[%s1425_s1 + $0x6c] ss:$16 sps:$4 sm:$0xff]   ;;  %v944_v14 = vld [vmem:[%s1425_s1 + $0x60] ss:$16 sps:$4 sm:$0xff]  }
   0x6   :  { %v945_v15 = vld [vmem:[%s1425_s1 + $0x68] ss:$16 sps:$4 sm:$0xff]   ;;  %v946_v16 = vld [vmem:[%s1425_s1 + $0x84] ss:$16 sps:$4 sm:$0xff]   ;;  %v948_v17 = vld [vmem:[%s1425_s1 + $0x8c] ss:$16 sps:$4 sm:$0xff]  }
   0x7   :  { %630 = vmatpush1.bf16.msra.mxu0 %v932_v6  ;;  %712 = vmatpush1.bf16.msra.mxu1 %v933_v7  ;;  %v950_v18 = vld [vmem:[%s1425_s1 + $0x80] ss:$16 sps:$4 sm:$0xff]   ;;  %v951_v19 = vld [vmem:[%s1425_s1 + $0x88] ss:$16 sps:$4 sm:$0xff]   ;;  %v952_v20 = vld [vmem:[%s1425_s1 + $0xa4] ss:$16 sps:$4 sm:$0xff]  }
   0x8   :  { %631 = vmatprep.subr.bf16.mxu0 %v934_v8  ;;  %713 = vmatprep.subr.bf16.mxu1 %v936_v9  ;;  %v954_v21 = vld [vmem:[%s1425_s1 + $0xac] ss:$16 sps:$4 sm:$0xff]   ;;  %v956_v22 = vld [vmem:[%s1425_s1 + $0xa0] ss:$16 sps:$4 sm:$0xff]   ;;  %v957_v23 = vld [vmem:[%s1425_s1 + $0xa8] ss:$16 sps:$4 sm:$0xff]  }
   0x9   :  { %v958_v24 = vld [vmem:[%s1425_s1 + $0xc4] ss:$16 sps:$4 sm:$0xff]   ;;  %v960_v25 = vld [vmem:[%s1425_s1 + $0xcc] ss:$16 sps:$4 sm:$0xff]   ;;  %v962_v26 = vld [vmem:[%s1425_s1 + $0xc0] ss:$16 sps:$4 sm:$0xff]  }
   0xa   :  { %v963_v27 = vld [vmem:[%s1425_s1 + $0xc8] ss:$16 sps:$4 sm:$0xff]   ;;  %v964_v28 = vld [vmem:[%s1425_s1 + $0xe4] ss:$16 sps:$4 sm:$0xff]   ;;  %v966_v29 = vld [vmem:[%s1425_s1 + $0xec] ss:$16 sps:$4 sm:$0xff]  }
   0xb   :  { %632 = vmatpush1.bf16.msra.mxu0 %v938_v10  ;;  %714 = vmatpush1.bf16.msra.mxu1 %v939_v11  ;;  %v968_v30 = vld [vmem:[%s1425_s1 + $0xe0] ss:$16 sps:$4 sm:$0xff]   ;;  %v969_v31 = vld [vmem:[%s1425_s1 + $0xe8] ss:$16 sps:$4 sm:$0xff]   ;;  %v970_v32 = vld [vmem:[%s1425_s1 + $0x104] ss:$16 sps:$4 sm:$0xff]  }
   0xc   :  { %633 = vmatprep.subr.bf16.mxu0 %v940_v12  ;;  %715 = vmatprep.subr.bf16.mxu1 %v942_v13  ;;  %v972_v33 = vld [vmem:[%s1425_s1 + $0x10c] ss:$16 sps:$4 sm:$0xff]   ;;  %v974_v34 = vld [vmem:[%s1425_s1 + $0x100] ss:$16 sps:$4 sm:$0xff]   ;;  %v975_v35 = vld [vmem:[%s1425_s1 + $0x108] ss:$16 sps:$4 sm:$0xff]  }
   0xd   :  { %v976_v36 = vld [vmem:[%s1425_s1 + $0x124] ss:$16 sps:$4 sm:$0xff]   ;;  %v978_v37 = vld [vmem:[%s1425_s1 + $0x12c] ss:$16 sps:$4 sm:$0xff]   ;;  %v980_v38 = vld [vmem:[%s1425_s1 + $0x120] ss:$16 sps:$4 sm:$0xff]  }
   0xe   :  { %v981_v39 = vld [vmem:[%s1425_s1 + $0x128] ss:$16 sps:$4 sm:$0xff]   ;;  %v982_v40 = vld [vmem:[%s1425_s1 + $0x144] ss:$16 sps:$4 sm:$0xff]   ;;  %v984_v41 = vld [vmem:[%s1425_s1 + $0x14c] ss:$16 sps:$4 sm:$0xff]  }
   0xf   :  { %634 = vmatpush1.bf16.msra.mxu0 %v944_v14  ;;  %716 = vmatpush1.bf16.msra.mxu1 %v945_v15  ;;  %v986_v42 = vld [vmem:[%s1425_s1 + $0x140] ss:$16 sps:$4 sm:$0xff]   ;;  %v987_v43 = vld [vmem:[%s1425_s1 + $0x148] ss:$16 sps:$4 sm:$0xff]   ;;  %v988_v44 = vld [vmem:[%s1425_s1 + $0x164] ss:$16 sps:$4 sm:$0xff]  }
  0x10   :  { %635 = vmatprep.subr.bf16.mxu0 %v946_v16  ;;  %717 = vmatprep.subr.bf16.mxu1 %v948_v17  ;;  %v990_v45 = vld [vmem:[%s1425_s1 + $0x16c] ss:$16 sps:$4 sm:$0xff]   ;;  %v16_v46 = vld [vmem:[%s1424_s0] sm:$0xff]  ;;  %v993_v49 = vld [vmem:[%s1425_s1 + $0x168] ss:$16 sps:$4 sm:$0xff]  }
  0x11   :  { %v992_v47 = vld [vmem:[%s1425_s1 + $0x160] ss:$16 sps:$4 sm:$0xff]   ;;  %v810_v48 = vcombine.high %v16_v46, %v16_v46  ;;  %v994_v50 = vld [vmem:[%s1425_s1 + $0x184] ss:$16 sps:$4 sm:$0xff]   ;;  %v996_v51 = vld [vmem:[%s1425_s1 + $0x18c] ss:$16 sps:$4 sm:$0xff]   ;;  %v809_v4 = vcombine.low %v16_v46, %v16_v46 }
  0x12   :  { %v998_v52 = vld [vmem:[%s1425_s1 + $0x180] ss:$16 sps:$4 sm:$0xff]   ;;  %v999_v53 = vld [vmem:[%s1425_s1 + $0x188] ss:$16 sps:$4 sm:$0xff]   ;;  %v1000_v54 = vld [vmem:[%s1425_s1 + $0x1a4] ss:$16 sps:$4 sm:$0xff]  }
  0x13   :  { %636 = vmatpush1.bf16.msra.mxu0 %v950_v18  ;;  %718 = vmatpush1.bf16.msra.mxu1 %v951_v19  ;;  %v1002_v55 = vld [vmem:[%s1425_s1 + $0x1ac] ss:$16 sps:$4 sm:$0xff]   ;;  %v1004_v56 = vld [vmem:[%s1425_s1 + $0x1a0] ss:$16 sps:$4 sm:$0xff]   ;;  %v1005_v57 = vld [vmem:[%s1425_s1 + $0x1a8] ss:$16 sps:$4 sm:$0xff]  }
  0x14   :  { %637 = vmatprep.subr.bf16.mxu0 %v952_v20  ;;  %719 = vmatprep.subr.bf16.mxu1 %v954_v21  ;;  %v1006_v58 = vld [vmem:[%s1425_s1 + $0x1c4] ss:$16 sps:$4 sm:$0xff]   ;;  %v1008_v59 = vld [vmem:[%s1425_s1 + $0x1cc] ss:$16 sps:$4 sm:$0xff]   ;;  %v1010_v60 = vld [vmem:[%s1425_s1 + $0x1c0] ss:$16 sps:$4 sm:$0xff]  }
  0x15   :  { %659 = vmatprep.mubr.bf16.mxu0 %v810_v48  ;;  %741 = vmatprep.mubr.bf16.mxu1 %v810_v48  ;;  %v1011_v61 = vld [vmem:[%s1425_s1 + $0x1c8] ss:$16 sps:$4 sm:$0xff]   ;;  %v1012_v62 = vld [vmem:[%s1425_s1 + $0x1e4] ss:$16 sps:$4 sm:$0xff]   ;;  %v1014_v63 = vld [vmem:[%s1425_s1 + $0x1ec] ss:$16 sps:$4 sm:$0xff]  }
  0x16   :  { %v1016_v0 = vld [vmem:[%s1425_s1 + $0x1e0] ss:$16 sps:$4 sm:$0xff]   ;;  %v1017_v1 = vld [vmem:[%s1425_s1 + $0x1e8] ss:$16 sps:$4 sm:$0xff]   ;;  %v1022_v2 = vld [vmem:[%s1425_s1 + $0x204] ss:$16 sps:$4 sm:$0xff]  }
  0x17   :  { %638 = vmatpush1.bf16.msra.mxu0 %v956_v22  ;;  %720 = vmatpush1.bf16.msra.mxu1 %v957_v23  ;;  %v1025_v3 = vld [vmem:[%s1425_s1 + $0x20c] ss:$16 sps:$4 sm:$0xff]   ;;  %v1020_v5 = vld [vmem:[%s1425_s1 + $0x200] ss:$16 sps:$4 sm:$0xff]   ;;  %v1023_v6 = vld [vmem:[%s1425_s1 + $0x208] ss:$16 sps:$4 sm:$0xff]  }
  0x18   :  { %639 = vmatprep.subr.bf16.mxu0 %v958_v24  ;;  %721 = vmatprep.subr.bf16.mxu1 %v960_v25  ;;  %v1028_v7 = vld [vmem:[%s1425_s1 + $0x224] ss:$16 sps:$4 sm:$0xff]   ;;  %v1031_v8 = vld [vmem:[%s1425_s1 + $0x22c] ss:$16 sps:$4 sm:$0xff]  }
  0x1b   :  { %640 = vmatpush1.bf16.msra.mxu0 %v962_v26  ;;  %722 = vmatpush1.bf16.msra.mxu1 %v963_v27 }
  0x1c   :  { %641 = vmatprep.subr.bf16.mxu0 %v964_v28  ;;  %723 = vmatprep.subr.bf16.mxu1 %v966_v29 }
  0x1f   :  { %642 = vmatpush1.bf16.msra.mxu0 %v968_v30  ;;  %724 = vmatpush1.bf16.msra.mxu1 %v969_v31 }
  0x20   :  { %643 = vmatprep.subr.bf16.mxu0 %v970_v32  ;;  %725 = vmatprep.subr.bf16.mxu1 %v972_v33 }
  0x23   :  { %644 = vmatpush1.bf16.msra.mxu0 %v974_v34  ;;  %726 = vmatpush1.bf16.msra.mxu1 %v975_v35 }
  0x24   :  { %645 = vmatprep.subr.bf16.mxu0 %v976_v36  ;;  %727 = vmatprep.subr.bf16.mxu1 %v978_v37 }
  0x27   :  { %646 = vmatpush1.bf16.msra.mxu0 %v980_v38  ;;  %728 = vmatpush1.bf16.msra.mxu1 %v981_v39 }
  0x28   :  { %647 = vmatprep.subr.bf16.mxu0 %v982_v40  ;;  %729 = vmatprep.subr.bf16.mxu1 %v984_v41 }
  0x2b   :  { %648 = vmatpush1.bf16.msra.mxu0 %v986_v42  ;;  %730 = vmatpush1.bf16.msra.mxu1 %v987_v43 }
  0x2c   :  { %649 = vmatprep.subr.bf16.mxu0 %v988_v44  ;;  %731 = vmatprep.subr.bf16.mxu1 %v990_v45 }
  0x2f   :  { %650 = vmatpush1.bf16.msra.mxu0 %v992_v47  ;;  %732 = vmatpush1.bf16.msra.mxu1 %v993_v49 }
  0x30   :  { %651 = vmatprep.subr.bf16.mxu0 %v994_v50  ;;  %733 = vmatprep.subr.bf16.mxu1 %v996_v51 }
  0x33   :  { %652 = vmatpush1.bf16.msra.mxu0 %v998_v52  ;;  %734 = vmatpush1.bf16.msra.mxu1 %v999_v53 }
  0x34   :  { %653 = vmatprep.subr.bf16.mxu0 %v1000_v54  ;;  %735 = vmatprep.subr.bf16.mxu1 %v1002_v55 }
  0x37   :  { %654 = vmatpush1.bf16.msra.mxu0 %v1004_v56  ;;  %736 = vmatpush1.bf16.msra.mxu1 %v1005_v57 }
  0x38   :  { %655 = vmatprep.subr.bf16.mxu0 %v1006_v58  ;;  %737 = vmatprep.subr.bf16.mxu1 %v1008_v59 }
  0x3b   :  { %656 = vmatpush1.bf16.msra.mxu0 %v1010_v60  ;;  %738 = vmatpush1.bf16.msra.mxu1 %v1011_v61 }
  0x3c   :  { %657 = vmatprep.subr.bf16.mxu0 %v1012_v62  ;;  %739 = vmatprep.subr.bf16.mxu1 %v1014_v63 }
  0x3f   :  { %658 = vmatpush1.bf16.msra.mxu0 %v1016_v0  ;;  %740 = vmatpush1.bf16.msra.mxu1 %v1017_v1 }
  0x40   :  { %668 = vmatprep.subr.bf16.mxu0 %v1022_v2  ;;  %750 = vmatprep.subr.bf16.mxu1 %v1025_v3 }
  0x41   :  { %8 = vsyncpa [#allocation3], 0  ;;  %v1026_v9 = vld [vmem:[%s1425_s1 + $0x220] ss:$16 sps:$4 sm:$0xff]   ;;  %v1029_v10 = vld [vmem:[%s1425_s1 + $0x228] ss:$16 sps:$4 sm:$0xff]   ;;  %v116_v37 = vlaneseq }
  0x42   :  { %660 = vmatmul.mubr.bf16.vlgmr.msra.gmra.mrb[0].mxu0 %v809_v4  ;;  %742 = vmatmul.mubr.bf16.vlgmr.msra.gmra.mrb[0].mxu1 %v809_v4  ;;  %v1034_v11 = vld [vmem:[%s1425_s1 + $0x244] ss:$16 sps:$4 sm:$0xff]   ;;  %v1037_v12 = vld [vmem:[%s1425_s1 + $0x24c] ss:$16 sps:$4 sm:$0xff]   ;;  %v1093_v13 = vmov 0  }
  0x43   :  { %669 = vmatpush1.bf16.msra.mxu0 %v1020_v5  ;;  %751 = vmatpush1.bf16.msra.mxu1 %v1023_v6  ;;  %v1032_v14 = vld [vmem:[%s1425_s1 + $0x240] ss:$16 sps:$4 sm:$0xff]   ;;  %v1035_v15 = vld [vmem:[%s1425_s1 + $0x248] ss:$16 sps:$4 sm:$0xff]   ;;  %v1040_v16 = vld [vmem:[%s1425_s1 + $0x264] ss:$16 sps:$4 sm:$0xff]  }
  0x44   :  { %670 = vmatprep.subr.bf16.mxu0 %v1028_v7  ;;  %752 = vmatprep.subr.bf16.mxu1 %v1031_v8  ;;  %v1043_v17 = vld [vmem:[%s1425_s1 + $0x26c] ss:$16 sps:$4 sm:$0xff]   ;;  %v1038_v18 = vld [vmem:[%s1425_s1 + $0x260] ss:$16 sps:$4 sm:$0xff]   ;;  %v1041_v19 = vld [vmem:[%s1425_s1 + $0x268] ss:$16 sps:$4 sm:$0xff]  }
  0x45   :  { %700 = vmatprep.mubr.bf16.mxu0 %v1093_v13  ;;  %782 = vmatprep.mubr.bf16.mxu1 %v1093_v13  ;;  %v1046_v20 = vld [vmem:[%s1425_s1 + $0x284] ss:$16 sps:$4 sm:$0xff]   ;;  %v1049_v21 = vld [vmem:[%s1425_s1 + $0x28c] ss:$16 sps:$4 sm:$0xff]   ;;  %v1044_v22 = vld [vmem:[%s1425_s1 + $0x280] ss:$16 sps:$4 sm:$0xff]  }
  0x46   :  { %v1047_v23 = vld [vmem:[%s1425_s1 + $0x288] ss:$16 sps:$4 sm:$0xff]   ;;  %v1052_v24 = vld [vmem:[%s1425_s1 + $0x2a4] ss:$16 sps:$4 sm:$0xff]   ;;  %v1055_v25 = vld [vmem:[%s1425_s1 + $0x2ac] ss:$16 sps:$4 sm:$0xff]  }
  0x47   :  { %671 = vmatpush1.bf16.msra.mxu0 %v1026_v9  ;;  %753 = vmatpush1.bf16.msra.mxu1 %v1029_v10  ;;  %v1050_v26 = vld [vmem:[%s1425_s1 + $0x2a0] ss:$16 sps:$4 sm:$0xff]   ;;  %v1053_v27 = vld [vmem:[%s1425_s1 + $0x2a8] ss:$16 sps:$4 sm:$0xff]   ;;  %v1058_v28 = vld [vmem:[%s1425_s1 + $0x2c4] ss:$16 sps:$4 sm:$0xff]  }
  0x48   :  { %672 = vmatprep.subr.bf16.mxu0 %v1034_v11  ;;  %754 = vmatprep.subr.bf16.mxu1 %v1037_v12  ;;  %v1061_v29 = vld [vmem:[%s1425_s1 + $0x2cc] ss:$16 sps:$4 sm:$0xff]   ;;  %v1056_v30 = vld [vmem:[%s1425_s1 + $0x2c0] ss:$16 sps:$4 sm:$0xff]   ;;  %v1059_v31 = vld [vmem:[%s1425_s1 + $0x2c8] ss:$16 sps:$4 sm:$0xff]  }
  0x49   :  { %v1064_v32 = vld [vmem:[%s1425_s1 + $0x2e4] ss:$16 sps:$4 sm:$0xff]   ;;  %v1067_v33 = vld [vmem:[%s1425_s1 + $0x2ec] ss:$16 sps:$4 sm:$0xff]   ;;  %v1062_v34 = vld [vmem:[%s1425_s1 + $0x2e0] ss:$16 sps:$4 sm:$0xff]  }
  0x4a   :  { %v1065_v35 = vld [vmem:[%s1425_s1 + $0x2e8] ss:$16 sps:$4 sm:$0xff]   ;;  %v117_v38 = vshrl.u32 %v116_v37, 7  ;;  %v114_v41 = vld [vmem:[%s1426_s2] sm:$0xf]  ;;  %s1094_s1 = smov [#allocation2]  }
  0x4b   :  { %673 = vmatpush1.bf16.msra.mxu0 %v1032_v14  ;;  %755 = vmatpush1.bf16.msra.mxu1 %v1035_v15  ;;  %v1068_v36 = vld [vmem:[%s1424_s0 + $0x8] ss:$0 sps:$4 sm:$0xff]   ;;  %s801_s0 = sshll.u32 %s1094_s1, 4  ;;  %s802_s0 = int_to_ptr.vmem [resolvable:$true] %s801_s0 }
  0x4c   :  { %674 = vmatprep.subr.bf16.mxu0 %v1040_v16  ;;  %756 = vmatprep.subr.bf16.mxu1 %v1043_v17  ;;  %v118_v39 = vsub.s32 0, %v117_v38  ;;  %v126_v40 = vsub.s32 2, %v117_v38  ;;  %v122_v42 = vsub.s32 1, %v117_v38  ;;  %v130_v43 = vsub.s32 3, %v117_v38  ;;  %s1069_s2 = scalar_lea.vmem %s802_s0, 512  ;;  %p1074_p1 = scmp.lt.s32.totalorder %s802_s0, %s802_s0 }
  0x4d   :  { %p1070_p0 = scmp.ne.s32.totalorder %s802_s0, %s1069_s2  ;;  %p1075_p2 = scmp.lt.s32.totalorder %s1069_s2, %s1069_s2 }
  0x4e   :  { %v119_v44 = vrot.slane %v114_v41, %v118_v39  ;;  %v127_v45 = vrot.slane %v114_v41, %v126_v40  ;;  %v123_v46 = vrot.slane %v114_v41, %v122_v42  ;;  %v131_v47 = vrot.slane %v114_v41, %v130_v43 }
  0x4f   :  { %675 = vmatpush1.bf16.msra.mxu0 %v1038_v18  ;;  %757 = vmatpush1.bf16.msra.mxu1 %v1041_v19  ;;  %p1076_p3 = por %p1075_p2, %p1074_p1 }
  0x50   :  { %676 = vmatprep.subr.bf16.mxu0 %v1046_v20  ;;  %758 = vmatprep.subr.bf16.mxu1 %v1049_v21 }
  0x51   :  { %p1077_p4 = pnand %p1076_p3, %p1070_p0 }
  0x53   :  { %677 = vmatpush1.bf16.msra.mxu0 %v1044_v22  ;;  %759 = vmatpush1.bf16.msra.mxu1 %v1047_v23 }
  0x54   :  { %678 = vmatprep.subr.bf16.mxu0 %v1052_v24  ;;  %760 = vmatprep.subr.bf16.mxu1 %v1055_v25 }
  0x57   :  { %679 = vmatpush1.bf16.msra.mxu0 %v1050_v26  ;;  %761 = vmatpush1.bf16.msra.mxu1 %v1053_v27 }
  0x58   :  { %680 = vmatprep.subr.bf16.mxu0 %v1058_v28  ;;  %762 = vmatprep.subr.bf16.mxu1 %v1061_v29 }
  0x5b   :  { %681 = vmatpush1.bf16.msra.mxu0 %v1056_v30  ;;  %763 = vmatpush1.bf16.msra.mxu1 %v1059_v31 }
  0x5c   :  { %682 = vmatprep.subr.bf16.mxu0 %v1064_v32  ;;  %764 = vmatprep.subr.bf16.mxu1 %v1067_v33 }
  0x5f   :  { %683 = vmatpush1.bf16.msra.mxu0 %v1062_v34  ;;  %765 = vmatpush1.bf16.msra.mxu1 %v1065_v35 }
  0x62   :  { %701 = vmatmul.mubr.bf16.vlgmr.msra.gmra.mrb[0].mxu0 %v1068_v36  ;;  %783 = vmatmul.mubr.bf16.vlgmr.msra.gmra.mrb[0].mxu1 %v1068_v36 }
 0x135   :  { %v702_v48 = vpop.f32.mrb[0].mxu0  ;;  %v784_v49 = vpop.f32.mrb[0].mxu1 }
 0x136   :  { %v908_v50 = vadd.f32 %v702_v48, %v119_v44  ;;  %v910_v51 = vadd.f32 %v784_v49, %v127_v45  ;;  %v704_v52 = vpop.f32.mrb[1].mxu0  ;;  %v786_v53 = vpop.f32.mrb[1].mxu1 }
 0x137   :  { %v909_v54 = vadd.f32 %v704_v52, %v123_v46  ;;  %v911_v55 = vadd.f32 %v786_v53, %v131_v47  ;;  %v706_v56 = vpop.f32.mrb[2].mxu0  ;;  %v788_v57 = vpop.f32.mrb[2].mxu1 }
 0x138   :  { %791 = vst [vmem:[#allocation2] sm:$0xff] %v908_v50  ;;  %793 = vst [vmem:[#allocation2 + $0x10] sm:$0xff] %v910_v51  ;;  %v707_v58 = vpop.f32.mrb[3].mxu0  ;;  %v789_v59 = vpop.f32.mrb[3].mxu1 }
 0x139   :  { %792 = vst [vmem:[#allocation2 + $0x8] sm:$0xff] %v909_v54  ;;  %794 = vst [vmem:[#allocation2 + $0x18] sm:$0xff] %v911_v55 }
 0x13a   :  { %1080 = shalt.err (!%p1077_p4)
}
 0x13b   :  { %s1081_s23 = scalar_lea.hbm %s1427_s3, 512 }
 0x13c   :  { %p1082_p5 = scmp.ne.s32.totalorder %s1427_s3, %s1081_s23  ;;  %p1085_p6 = scmp.lt.u32.totalorder %s1081_s23, %s1427_s3 }
 0x13e   :  { %p1087_p7 = pnand %p1085_p6, %p1082_p5 }
 0x140   :  { %1090 = shalt.err (!%p1087_p7)
}
 0x141   :  { %804 = dma.vmem_to_hbm [thread:$0]  %s802_s0, 512, %s1427_s3, [#allocation3]  }
 0x142   :  { %1091 = dma.done.wait [#allocation3], 512  }
 0x143   :  { %1092 = vsyncadd [#allocation3], 4294966784 }
 0x144   :  { %808 = vsyncpa [#allocation3], 1 }

</bundles_post_ra>
